<compile_context>
chip_gen: v5e
topology: v5e:2x2
jax: 0.10.0
libtpu: 0.0.40
codegen_flags: <defaults>
</compile_context>

<pallas_src>
import functools

import jax
import jax.numpy as jnp
from jax import lax
from jax.experimental import pallas as pl
from jax.experimental.pallas import tpu as pltpu


def _round_up(a, b):
    return (a + b - 1) // b * b


def _rnn_recurrence_kernel(xproj_ref, h0_ref, wh_ref, hall_ref, h_scratch):
    """Sequential part only: h_t = tanh(xproj_t + h_{t-1} @ Wh) for one time chunk.

    xproj_ref: (T_CHUNK, Bp, Hp) precomputed x_t @ Wx + (bx + bh)
    h0_ref:    (Bp, Hp)          initial hidden state (resident)
    wh_ref:    (Hp, Hp)          recurrent weight (resident)
    hall_ref:  (T_CHUNK, Bp, Hp) output slab for this chunk
    h_scratch: (Bp, Hp) f32      running hidden state, persists across grid steps
    """
    t_chunk = xproj_ref.shape[0]

    # Initialize the recurrent state from h0 on the first chunk.
    @pl.when(pl.program_id(0) == 0)
    def _():
        h_scratch[...] = h0_ref[...].astype(jnp.float32)

    wh = wh_ref[...]  # hoist the resident weight load out of the unrolled loop

    def step(t, h):
        pre = xproj_ref[t] + jnp.dot(h, wh, preferred_element_type=jnp.float32)
        h_new = jnp.tanh(pre)
        hall_ref[t] = h_new.astype(hall_ref.dtype)
        return h_new

    # Fully unrolled: static indices -> unmasked, lane-dense stores per step.
    h_scratch[...] = lax.fori_loop(0, t_chunk, step, h_scratch[...], unroll=True)


@functools.partial(jax.jit, static_argnames=("t_chunk",))
def rnn_forward(x, h0, wx, bx, wh, bh, *, t_chunk=8):
    """x: (L, B, D); h0: (B, H); wx: (D, H); bx: (1, H); wh: (H, H); bh: (1, H).

    Returns (h_all: (L, B, H), h_final: (B, H)) matching the PyTorch forward.
    """
    L, B, D = x.shape
    H = h0.shape[1]

    # Lane/sublane-aligned padded sizes (f32: sublane 8, lane 128).
    Bp = _round_up(B, 8)
    Hp = _round_up(H, 128)
    Lp = _round_up(L, t_chunk)

    # ---- Hoisted, non-recurrent input projection over all timesteps (one big
    # matmul in XLA) with the two biases pre-summed. ------------------------------
    xproj = jnp.einsum("lbd,dh->lbh", x.astype(jnp.float32), wx.astype(jnp.float32),
                       preferred_element_type=jnp.float32) + (bx + bh)  # (L, B, H)

    # ---- Zero-pad to aligned tiles. Zero padding keeps padded hidden columns
    # exactly zero through the whole recurrence (zero Wh rows/cols, zero bias). ----
    xproj_p = jnp.zeros((Lp, Bp, Hp), jnp.float32).at[:L, :B, :H].set(xproj)
    h0_p = jnp.zeros((Bp, Hp), jnp.float32).at[:B, :H].set(h0.astype(jnp.float32))
    wh_p = jnp.zeros((Hp, Hp), jnp.float32).at[:H, :H].set(wh.astype(jnp.float32))

    grid_spec = pltpu.PrefetchScalarGridSpec(
        num_scalar_prefetch=0,
        grid=(Lp // t_chunk,),
        in_specs=[
            pl.BlockSpec((t_chunk, Bp, Hp), lambda c: (c, 0, 0)),  # xproj chunk
            pl.BlockSpec((Bp, Hp), lambda c: (0, 0)),              # h0 (resident)
            pl.BlockSpec((Hp, Hp), lambda c: (0, 0)),              # Wh (resident)
        ],
        out_specs=pl.BlockSpec((t_chunk, Bp, Hp), lambda c: (c, 0, 0)),  # h_all chunk
        scratch_shapes=[pltpu.VMEM((Bp, Hp), jnp.float32)],
    )

    h_all_p = pl.pallas_call(
        _rnn_recurrence_kernel,
        out_shape=jax.ShapeDtypeStruct((Lp, Bp, Hp), x.dtype),
        grid_spec=grid_spec,
        compiler_params=pltpu.CompilerParams(
            dimension_semantics=("arbitrary",),  # sequential recurrence over time
        ),
    )(xproj_p, h0_p, wh_p)

    h_all = h_all_p[:L, :B, :H]
    h_final = h_all[-1]
    return h_all, h_final


def rnn_forward_ref(x, h0, wx, bx, wh, bh):
    """Pure-JAX reference (lax.scan) matching the PyTorch forward."""
    def step(h, x_t):
        h_new = jnp.tanh(x_t @ wx + bx[0] + h @ wh + bh[0])
        return h_new, h_new
    h_final, h_all = lax.scan(step, h0, x)
    return h_all, h_final


def init_params(key, input_size, hidden_size):
    """Deterministic init mirroring nn.Linear's U(-1/sqrt(fan_in), 1/sqrt(fan_in))."""
    k1, k2, k3, k4 = jax.random.split(key, 4)
    bx_bound = 1.0 / jnp.sqrt(input_size)
    bh_bound = 1.0 / jnp.sqrt(hidden_size)
    wx = jax.random.uniform(k1, (input_size, hidden_size), jnp.float32,
                            -bx_bound, bx_bound)
    bx = jax.random.uniform(k2, (1, hidden_size), jnp.float32, -bx_bound, bx_bound)
    wh = jax.random.uniform(k3, (hidden_size, hidden_size), jnp.float32,
                            -bh_bound, bh_bound)
    bh = jax.random.uniform(k4, (1, hidden_size), jnp.float32, -bh_bound, bh_bound)
    return wx, bx, wh, bh


if __name__ == "__main__":
    # Small shapes consistent with the module's forward: x is (length, batch, dim).
    L, B, D, H = 8, 2, 4, 32

    key = jax.random.PRNGKey(0)
    k_x, k_h, k_p = jax.random.split(key, 3)

    x = jax.random.normal(k_x, (L, B, D), dtype=jnp.float32)
    h0 = jax.random.normal(k_h, (B, H), dtype=jnp.float32)
    wx, bx, wh, bh = init_params(k_p, D, H)

    h_all, h_final = rnn_forward(x, h0, wx, bx, wh, bh, t_chunk=8)
    jax.block_until_ready((h_all, h_final))

    # Verify against the pure-JAX reference.
    h_all_ref, h_final_ref = rnn_forward_ref(x, h0, wx, bx, wh, bh)
    assert h_all.shape == (L, B, H)
    assert h_final.shape == (B, H)
    assert jnp.allclose(h_all, h_all_ref, atol=1e-5, rtol=1e-5)
    assert jnp.allclose(h_final, h_final_ref, atol=1e-5, rtol=1e-5)

    # TODO(synk): decode()'s log_softmax head is not part of forward(); left out of the kernel.
    print("KERNEL_OK")
</pallas_src>

<mosaic_0001>
module attributes {stable_mosaic.version = 11 : i64} {
  func.func @_rnn_recurrence_kernel(%arg0: i32, %arg1: memref<8x8x128xf32, #tpu.memory_space<vmem>>, %arg2: memref<8x128xf32, #tpu.memory_space<vmem>>, %arg3: memref<128x128xf32, #tpu.memory_space<vmem>>, %arg4: memref<8x8x128xf32, #tpu.memory_space<vmem>>, %arg5: memref<8x128xf32, #tpu.memory_space<vmem>>) attributes {dimension_semantics = [#tpu.dimension_semantics<arbitrary>], iteration_bounds = array<i64: 1>, scalar_prefetch = 0 : i64, scratch_operands = 1 : i64, tpu.core_type = #tpu.core_type<tc>, window_params = [{transform_indices = @transform_0, window_bounds = array<i64: 8, 8, 128>}, {pipeline_mode = #tpu.pipeline_mode<synchronous>, transform_indices = @transform_1, window_bounds = array<i64: 8, 128>}, {pipeline_mode = #tpu.pipeline_mode<synchronous>, transform_indices = @transform_2, window_bounds = array<i64: 128, 128>}, {transform_indices = @transform_3, window_bounds = array<i64: 8, 8, 128>}]} {
    %c0_i32 = arith.constant 0 : i32
    %0 = arith.cmpi eq, %arg0, %c0_i32 : i32
    %1 = arith.extui %0 : i1 to i32
    %c0_i32_0 = arith.constant 0 : i32
    %2 = arith.cmpi ne, %1, %c0_i32_0 : i32
    scf.if %2 {
      %c0_46 = arith.constant 0 : index
      %c0_47 = arith.constant 0 : index
      %86 = vector.load %arg2[%c0_46, %c0_47] : memref<8x128xf32, #tpu.memory_space<vmem>>, vector<8x128xf32>
      %c0_48 = arith.constant 0 : index
      %c0_49 = arith.constant 0 : index
      %87 = vector.load %arg5[%c0_48, %c0_49] : memref<8x128xf32, #tpu.memory_space<vmem>>, vector<8x128xf32>
      tpu.vector_store %arg5[%c0_48, %c0_49], %86 {strides = array<i32>} : memref<8x128xf32, #tpu.memory_space<vmem>>, vector<8x128xf32>,
    } else {
    }
    %c0 = arith.constant 0 : index
    %c0_1 = arith.constant 0 : index
    %3 = vector.load %arg3[%c0, %c0_1] : memref<128x128xf32, #tpu.memory_space<vmem>>, vector<128x128xf32>
    %c0_2 = arith.constant 0 : index
    %c0_3 = arith.constant 0 : index
    %4 = vector.load %arg5[%c0_2, %c0_3] : memref<8x128xf32, #tpu.memory_space<vmem>>, vector<8x128xf32>
    %c0_i32_4 = arith.constant 0 : i32
    %5 = arith.index_cast %c0_i32_4 : i32 to index
    %c0_5 = arith.constant 0 : index
    %c0_6 = arith.constant 0 : index
    %6 = vector.load %arg1[%5, %c0_5, %c0_6] : memref<8x8x128xf32, #tpu.memory_space<vmem>>, vector<1x8x128xf32>
    %7 = vector.shape_cast %6 : vector<1x8x128xf32> to vector<8x128xf32>
    %cst = arith.constant dense<0.000000e+00> : vector<8x128xf32>
    %8 = tpu.matmul %4, %3, %cst {dimension_numbers = #tpu.dot_dimension_numbers<[1], [0], [0], [1], [0, 0, 1, 1], [], []>} : vector<8x128xf32>, vector<128x128xf32>, vector<8x128xf32> -> vector<8x128xf32>
    %9 = arith.addf %7, %8 : vector<8x128xf32>
    %10 = math.tanh %9 : vector<8x128xf32>
    %11 = arith.index_cast %c0_i32_4 : i32 to index
    %c0_7 = arith.constant 0 : index
    %c0_8 = arith.constant 0 : index
    %12 = vector.load %arg4[%11, %c0_7, %c0_8] : memref<8x8x128xf32, #tpu.memory_space<vmem>>, vector<1x8x128xf32>
    %13 = vector.shape_cast %12 : vector<1x8x128xf32> to vector<8x128xf32>
    %14 = vector.shape_cast %10 : vector<8x128xf32> to vector<1x8x128xf32>
    tpu.vector_store %arg4[%11, %c0_7, %c0_8], %14 {strides = array<i32>} : memref<8x8x128xf32, #tpu.memory_space<vmem>>, vector<1x8x128xf32>,
    %c1_i32 = arith.constant 1 : i32
    %15 = arith.index_cast %c1_i32 : i32 to index
    %c0_9 = arith.constant 0 : index
    %c0_10 = arith.constant 0 : index
    %16 = vector.load %arg1[%15, %c0_9, %c0_10] : memref<8x8x128xf32, #tpu.memory_space<vmem>>, vector<1x8x128xf32>
    %17 = vector.shape_cast %16 : vector<1x8x128xf32> to vector<8x128xf32>
    %cst_11 = arith.constant dense<0.000000e+00> : vector<8x128xf32>
    %18 = tpu.matmul %10, %3, %cst_11 {dimension_numbers = #tpu.dot_dimension_numbers<[1], [0], [0], [1], [0, 0, 1, 1], [], []>} : vector<8x128xf32>, vector<128x128xf32>, vector<8x128xf32> -> vector<8x128xf32>
    %19 = arith.addf %17, %18 : vector<8x128xf32>
    %20 = math.tanh %19 : vector<8x128xf32>
    %21 = arith.index_cast %c1_i32 : i32 to index
    %c0_12 = arith.constant 0 : index
    %c0_13 = arith.constant 0 : index
    %22 = vector.load %arg4[%21, %c0_12, %c0_13] : memref<8x8x128xf32, #tpu.memory_space<vmem>>, vector<1x8x128xf32>
    %23 = vector.shape_cast %22 : vector<1x8x128xf32> to vector<8x128xf32>
    %24 = vector.shape_cast %20 : vector<8x128xf32> to vector<1x8x128xf32>
    tpu.vector_store %arg4[%21, %c0_12, %c0_13], %24 {strides = array<i32>} : memref<8x8x128xf32, #tpu.memory_space<vmem>>, vector<1x8x128xf32>,
    %c2_i32 = arith.constant 2 : i32
    %25 = arith.index_cast %c2_i32 : i32 to index
    %c0_14 = arith.constant 0 : index
    %c0_15 = arith.constant 0 : index
    %26 = vector.load %arg1[%25, %c0_14, %c0_15] : memref<8x8x128xf32, #tpu.memory_space<vmem>>, vector<1x8x128xf32>
    %27 = vector.shape_cast %26 : vector<1x8x128xf32> to vector<8x128xf32>
    %cst_16 = arith.constant dense<0.000000e+00> : vector<8x128xf32>
    %28 = tpu.matmul %20, %3, %cst_16 {dimension_numbers = #tpu.dot_dimension_numbers<[1], [0], [0], [1], [0, 0, 1, 1], [], []>} : vector<8x128xf32>, vector<128x128xf32>, vector<8x128xf32> -> vector<8x128xf32>
    %29 = arith.addf %27, %28 : vector<8x128xf32>
    %30 = math.tanh %29 : vector<8x128xf32>
    %31 = arith.index_cast %c2_i32 : i32 to index
    %c0_17 = arith.constant 0 : index
    %c0_18 = arith.constant 0 : index
    %32 = vector.load %arg4[%31, %c0_17, %c0_18] : memref<8x8x128xf32, #tpu.memory_space<vmem>>, vector<1x8x128xf32>
    %33 = vector.shape_cast %32 : vector<1x8x128xf32> to vector<8x128xf32>
    %34 = vector.shape_cast %30 : vector<8x128xf32> to vector<1x8x128xf32>
    tpu.vector_store %arg4[%31, %c0_17, %c0_18], %34 {strides = array<i32>} : memref<8x8x128xf32, #tpu.memory_space<vmem>>, vector<1x8x128xf32>,
    %c3_i32 = arith.constant 3 : i32
    %35 = arith.index_cast %c3_i32 : i32 to index
    %c0_19 = arith.constant 0 : index
    %c0_20 = arith.constant 0 : index
    %36 = vector.load %arg1[%35, %c0_19, %c0_20] : memref<8x8x128xf32, #tpu.memory_space<vmem>>, vector<1x8x128xf32>
    %37 = vector.shape_cast %36 : vector<1x8x128xf32> to vector<8x128xf32>
    %cst_21 = arith.constant dense<0.000000e+00> : vector<8x128xf32>
    %38 = tpu.matmul %30, %3, %cst_21 {dimension_numbers = #tpu.dot_dimension_numbers<[1], [0], [0], [1], [0, 0, 1, 1], [], []>} : vector<8x128xf32>, vector<128x128xf32>, vector<8x128xf32> -> vector<8x128xf32>
    %39 = arith.addf %37, %38 : vector<8x128xf32>
    %40 = math.tanh %39 : vector<8x128xf32>
    %41 = arith.index_cast %c3_i32 : i32 to index
    %c0_22 = arith.constant 0 : index
    %c0_23 = arith.constant 0 : index
    %42 = vector.load %arg4[%41, %c0_22, %c0_23] : memref<8x8x128xf32, #tpu.memory_space<vmem>>, vector<1x8x128xf32>
    %43 = vector.shape_cast %42 : vector<1x8x128xf32> to vector<8x128xf32>
    %44 = vector.shape_cast %40 : vector<8x128xf32> to vector<1x8x128xf32>
    tpu.vector_store %arg4[%41, %c0_22, %c0_23], %44 {strides = array<i32>} : memref<8x8x128xf32, #tpu.memory_space<vmem>>, vector<1x8x128xf32>,
    %c4_i32 = arith.constant 4 : i32
    %45 = arith.index_cast %c4_i32 : i32 to index
    %c0_24 = arith.constant 0 : index
    %c0_25 = arith.constant 0 : index
    %46 = vector.load %arg1[%45, %c0_24, %c0_25] : memref<8x8x128xf32, #tpu.memory_space<vmem>>, vector<1x8x128xf32>
    %47 = vector.shape_cast %46 : vector<1x8x128xf32> to vector<8x128xf32>
    %cst_26 = arith.constant dense<0.000000e+00> : vector<8x128xf32>
    %48 = tpu.matmul %40, %3, %cst_26 {dimension_numbers = #tpu.dot_dimension_numbers<[1], [0], [0], [1], [0, 0, 1, 1], [], []>} : vector<8x128xf32>, vector<128x128xf32>, vector<8x128xf32> -> vector<8x128xf32>
    %49 = arith.addf %47, %48 : vector<8x128xf32>
    %50 = math.tanh %49 : vector<8x128xf32>
    %51 = arith.index_cast %c4_i32 : i32 to index
    %c0_27 = arith.constant 0 : index
    %c0_28 = arith.constant 0 : index
    %52 = vector.load %arg4[%51, %c0_27, %c0_28] : memref<8x8x128xf32, #tpu.memory_space<vmem>>, vector<1x8x128xf32>
    %53 = vector.shape_cast %52 : vector<1x8x128xf32> to vector<8x128xf32>
    %54 = vector.shape_cast %50 : vector<8x128xf32> to vector<1x8x128xf32>
    tpu.vector_store %arg4[%51, %c0_27, %c0_28], %54 {strides = array<i32>} : memref<8x8x128xf32, #tpu.memory_space<vmem>>, vector<1x8x128xf32>,
    %c5_i32 = arith.constant 5 : i32
    %55 = arith.index_cast %c5_i32 : i32 to index
    %c0_29 = arith.constant 0 : index
    %c0_30 = arith.constant 0 : index
    %56 = vector.load %arg1[%55, %c0_29, %c0_30] : memref<8x8x128xf32, #tpu.memory_space<vmem>>, vector<1x8x128xf32>
    %57 = vector.shape_cast %56 : vector<1x8x128xf32> to vector<8x128xf32>
    %cst_31 = arith.constant dense<0.000000e+00> : vector<8x128xf32>
    %58 = tpu.matmul %50, %3, %cst_31 {dimension_numbers = #tpu.dot_dimension_numbers<[1], [0], [0], [1], [0, 0, 1, 1], [], []>} : vector<8x128xf32>, vector<128x128xf32>, vector<8x128xf32> -> vector<8x128xf32>
    %59 = arith.addf %57, %58 : vector<8x128xf32>
    %60 = math.tanh %59 : vector<8x128xf32>
    %61 = arith.index_cast %c5_i32 : i32 to index
    %c0_32 = arith.constant 0 : index
    %c0_33 = arith.constant 0 : index
    %62 = vector.load %arg4[%61, %c0_32, %c0_33] : memref<8x8x128xf32, #tpu.memory_space<vmem>>, vector<1x8x128xf32>
    %63 = vector.shape_cast %62 : vector<1x8x128xf32> to vector<8x128xf32>
    %64 = vector.shape_cast %60 : vector<8x128xf32> to vector<1x8x128xf32>
    tpu.vector_store %arg4[%61, %c0_32, %c0_33], %64 {strides = array<i32>} : memref<8x8x128xf32, #tpu.memory_space<vmem>>, vector<1x8x128xf32>,
    %c6_i32 = arith.constant 6 : i32
    %65 = arith.index_cast %c6_i32 : i32 to index
    %c0_34 = arith.constant 0 : index
    %c0_35 = arith.constant 0 : index
    %66 = vector.load %arg1[%65, %c0_34, %c0_35] : memref<8x8x128xf32, #tpu.memory_space<vmem>>, vector<1x8x128xf32>
    %67 = vector.shape_cast %66 : vector<1x8x128xf32> to vector<8x128xf32>
    %cst_36 = arith.constant dense<0.000000e+00> : vector<8x128xf32>
    %68 = tpu.matmul %60, %3, %cst_36 {dimension_numbers = #tpu.dot_dimension_numbers<[1], [0], [0], [1], [0, 0, 1, 1], [], []>} : vector<8x128xf32>, vector<128x128xf32>, vector<8x128xf32> -> vector<8x128xf32>
    %69 = arith.addf %67, %68 : vector<8x128xf32>
    %70 = math.tanh %69 : vector<8x128xf32>
    %71 = arith.index_cast %c6_i32 : i32 to index
    %c0_37 = arith.constant 0 : index
    %c0_38 = arith.constant 0 : index
    %72 = vector.load %arg4[%71, %c0_37, %c0_38] : memref<8x8x128xf32, #tpu.memory_space<vmem>>, vector<1x8x128xf32>
    %73 = vector.shape_cast %72 : vector<1x8x128xf32> to vector<8x128xf32>
    %74 = vector.shape_cast %70 : vector<8x128xf32> to vector<1x8x128xf32>
    tpu.vector_store %arg4[%71, %c0_37, %c0_38], %74 {strides = array<i32>} : memref<8x8x128xf32, #tpu.memory_space<vmem>>, vector<1x8x128xf32>,
    %c7_i32 = arith.constant 7 : i32
    %75 = arith.index_cast %c7_i32 : i32 to index
    %c0_39 = arith.constant 0 : index
    %c0_40 = arith.constant 0 : index
    %76 = vector.load %arg1[%75, %c0_39, %c0_40] : memref<8x8x128xf32, #tpu.memory_space<vmem>>, vector<1x8x128xf32>
    %77 = vector.shape_cast %76 : vector<1x8x128xf32> to vector<8x128xf32>
    %cst_41 = arith.constant dense<0.000000e+00> : vector<8x128xf32>
    %78 = tpu.matmul %70, %3, %cst_41 {dimension_numbers = #tpu.dot_dimension_numbers<[1], [0], [0], [1], [0, 0, 1, 1], [], []>} : vector<8x128xf32>, vector<128x128xf32>, vector<8x128xf32> -> vector<8x128xf32>
    %79 = arith.addf %77, %78 : vector<8x128xf32>
    %80 = math.tanh %79 : vector<8x128xf32>
    %81 = arith.index_cast %c7_i32 : i32 to index
    %c0_42 = arith.constant 0 : index
    %c0_43 = arith.constant 0 : index
    %82 = vector.load %arg4[%81, %c0_42, %c0_43] : memref<8x8x128xf32, #tpu.memory_space<vmem>>, vector<1x8x128xf32>
    %83 = vector.shape_cast %82 : vector<1x8x128xf32> to vector<8x128xf32>
    %84 = vector.shape_cast %80 : vector<8x128xf32> to vector<1x8x128xf32>
    tpu.vector_store %arg4[%81, %c0_42, %c0_43], %84 {strides = array<i32>} : memref<8x8x128xf32, #tpu.memory_space<vmem>>, vector<1x8x128xf32>,
    %c8_i32 = arith.constant 8 : i32
    %c0_44 = arith.constant 0 : index
    %c0_45 = arith.constant 0 : index
    %85 = vector.load %arg5[%c0_44, %c0_45] : memref<8x128xf32, #tpu.memory_space<vmem>>, vector<8x128xf32>
    tpu.vector_store %arg5[%c0_44, %c0_45], %80 {strides = array<i32>} : memref<8x128xf32, #tpu.memory_space<vmem>>, vector<8x128xf32>,
    return
  }
  func.func @transform_0(%arg0: i32) -> (i32, i32, i32) {
    %c0_i32 = arith.constant 0 : i32
    %c0_i32_0 = arith.constant 0 : i32
    %c0_i32_1 = arith.constant 0 : i32
    return %arg0, %c0_i32, %c0_i32_0 : i32, i32, i32
  }
  func.func @transform_1(%arg0: i32) -> (i32, i32) {
    %c0_i32 = arith.constant 0 : i32
    %c0_i32_0 = arith.constant 0 : i32
    %c0_i32_1 = arith.constant 0 : i32
    return %c0_i32, %c0_i32_0 : i32, i32
  }
  func.func @transform_2(%arg0: i32) -> (i32, i32) {
    %c0_i32 = arith.constant 0 : i32
    %c0_i32_0 = arith.constant 0 : i32
    %c0_i32_1 = arith.constant 0 : i32
    return %c0_i32, %c0_i32_0 : i32, i32
  }
  func.func @transform_3(%arg0: i32) -> (i32, i32, i32) {
    %c0_i32 = arith.constant 0 : i32
    %c0_i32_0 = arith.constant 0 : i32
    %c0_i32_1 = arith.constant 0 : i32
    return %arg0, %c0_i32, %c0_i32_0 : i32, i32, i32
  }
}

</mosaic_0001>

<bundles_post_ra>
// kernel: rnn_forward.1
= control target key start
LH: loop header
LB: loop body
LE: loop exit
PB: predicated region body
PF: predicated region fallthrough
CT: control target
= control target key end

     0   :  { %s557_s2 = inlined_call_operand.vmem [shape: f32[128,128], index: 2, kind: input, shape index: {}]   ;;  %s558_s1 = inlined_call_operand.vmem [shape: f32[8,128], index: 1, kind: input, shape index: {}]   ;;  %s559_s0 = inlined_call_operand.vmem [shape: f32[8,8,128], index: 0, kind: input, shape index: {}]   ;;  %s560_s3 = inlined_call_operand.vmem [shape: f32[8,8,128], index: 3, kind: output, shape index: {}]  }
   0x1   :  { %v301_v0 = vld [vmem:[%s557_s2 + $0x78] sm:$0xff]  ;;  %v306_v1 = vld [vmem:[%s557_s2 + $0x70] sm:$0xff]  ;;  %v313_v2 = vld [vmem:[%s557_s2 + $0x68] sm:$0xff] }
   0x2   :  { %38 = vmatpush.msra.mxu0 %v301_v0  ;;  %63 = vmatpush.msra.mxu1 %v301_v0  ;;  %v322_v3 = vld [vmem:[%s557_s2 + $0x60] sm:$0xff]  ;;  %v331_v4 = vld [vmem:[%s557_s2 + $0x58] sm:$0xff]  ;;  %v340_v5 = vld [vmem:[%s557_s2 + $0x50] sm:$0xff] }
   0x3   :  { %89 = vmatpush.msra.mxu2 %v301_v0  ;;  %115 = vmatpush.msra.mxu3 %v301_v0  ;;  %v349_v6 = vld [vmem:[%s557_s2 + $0x48] sm:$0xff]  ;;  %v358_v7 = vld [vmem:[%s557_s2 + $0x40] sm:$0xff]  ;;  %v367_v8 = vld [vmem:[%s557_s2 + $0x38] sm:$0xff] }
   0x4   :  { %39 = vmatpush.msra.mxu0 %v306_v1  ;;  %64 = vmatpush.msra.mxu1 %v306_v1  ;;  %v376_v9 = vld [vmem:[%s557_s2 + $0x30] sm:$0xff]  ;;  %v385_v10 = vld [vmem:[%s557_s2 + $0x28] sm:$0xff]  ;;  %v394_v11 = vld [vmem:[%s557_s2 + $0x20] sm:$0xff] }
   0x5   :  { %90 = vmatpush.msra.mxu2 %v306_v1  ;;  %116 = vmatpush.msra.mxu3 %v306_v1  ;;  %v403_v12 = vld [vmem:[%s557_s2 + $0x18] sm:$0xff]  ;;  %v412_v13 = vld [vmem:[%s557_s2 + $0x10] sm:$0xff]  ;;  %v421_v14 = vld [vmem:[%s557_s2 + $0x8] sm:$0xff] }
   0x6   :  { %40 = vmatpush.msra.mxu0 %v313_v2  ;;  %65 = vmatpush.msra.mxu1 %v313_v2  ;;  %v430_v15 = vld [vmem:[%s557_s2] sm:$0xff]  ;;  %v248_v21 = vld [vmem:[%s559_s0 + $0x8] sm:$0xff]  ;;  %v250_v25 = vld [vmem:[%s559_s0 + $0x10] sm:$0xff] }
   0x7   :  { %91 = vmatpush.msra.mxu2 %v313_v2  ;;  %117 = vmatpush.msra.mxu3 %v313_v2  ;;  %v18_v16 = vld [vmem:[%s558_s1] sm:$0xff]  ;;  %v252_v29 = vld [vmem:[%s559_s0 + $0x18] sm:$0xff]  ;;  %v256_v37 = vld [vmem:[%s559_s0 + $0x28] sm:$0xff] }
   0x8   :  { %41 = vmatpush.msra.mxu0 %v322_v3  ;;  %66 = vmatpush.msra.mxu1 %v322_v3  ;;  %v37_v17 = vld [vmem:[%s559_s0] sm:$0xff]  ;;  %v258_v41 = vld [vmem:[%s559_s0 + $0x30] sm:$0xff]  ;;  %v260_v45 = vld [vmem:[%s559_s0 + $0x38] sm:$0xff] }
   0x9   :  { %92 = vmatpush.msra.mxu2 %v322_v3  ;;  %118 = vmatpush.msra.mxu3 %v322_v3  ;;  %v254_v33 = vld [vmem:[%s559_s0 + $0x20] sm:$0xff] }
   0xa   :  { %42 = vmatpush.msra.mxu0 %v331_v4  ;;  %67 = vmatpush.msra.mxu1 %v331_v4 }
   0xb   :  { %93 = vmatpush.msra.mxu2 %v331_v4  ;;  %119 = vmatpush.msra.mxu3 %v331_v4 }
   0xc   :  { %43 = vmatpush.msra.mxu0 %v340_v5  ;;  %68 = vmatpush.msra.mxu1 %v340_v5 }
   0xd   :  { %94 = vmatpush.msra.mxu2 %v340_v5  ;;  %120 = vmatpush.msra.mxu3 %v340_v5 }
   0xe   :  { %44 = vmatpush.msra.mxu0 %v349_v6  ;;  %69 = vmatpush.msra.mxu1 %v349_v6 }
   0xf   :  { %95 = vmatpush.msra.mxu2 %v349_v6  ;;  %121 = vmatpush.msra.mxu3 %v349_v6 }
  0x10   :  { %45 = vmatpush.msra.mxu0 %v358_v7  ;;  %70 = vmatpush.msra.mxu1 %v358_v7 }
  0x11   :  { %96 = vmatpush.msra.mxu2 %v358_v7  ;;  %122 = vmatpush.msra.mxu3 %v358_v7 }
  0x12   :  { %46 = vmatpush.msra.mxu0 %v367_v8  ;;  %71 = vmatpush.msra.mxu1 %v367_v8 }
  0x13   :  { %97 = vmatpush.msra.mxu2 %v367_v8  ;;  %123 = vmatpush.msra.mxu3 %v367_v8 }
  0x14   :  { %47 = vmatpush.msra.mxu0 %v376_v9  ;;  %72 = vmatpush.msra.mxu1 %v376_v9 }
  0x15   :  { %98 = vmatpush.msra.mxu2 %v376_v9  ;;  %124 = vmatpush.msra.mxu3 %v376_v9 }
  0x16   :  { %48 = vmatpush.msra.mxu0 %v385_v10  ;;  %73 = vmatpush.msra.mxu1 %v385_v10 }
  0x17   :  { %99 = vmatpush.msra.mxu2 %v385_v10  ;;  %125 = vmatpush.msra.mxu3 %v385_v10 }
  0x18   :  { %49 = vmatpush.msra.mxu0 %v394_v11  ;;  %74 = vmatpush.msra.mxu1 %v394_v11 }
  0x19   :  { %100 = vmatpush.msra.mxu2 %v394_v11  ;;  %126 = vmatpush.msra.mxu3 %v394_v11 }
  0x1a   :  { %50 = vmatpush.msra.mxu0 %v403_v12  ;;  %75 = vmatpush.msra.mxu1 %v403_v12 }
  0x1b   :  { %101 = vmatpush.msra.mxu2 %v403_v12  ;;  %127 = vmatpush.msra.mxu3 %v403_v12 }
  0x1c   :  { %51 = vmatpush.msra.mxu0 %v412_v13  ;;  %76 = vmatpush.msra.mxu1 %v412_v13 }
  0x1d   :  { %102 = vmatpush.msra.mxu2 %v412_v13  ;;  %128 = vmatpush.msra.mxu3 %v412_v13 }
  0x1e   :  { %52 = vmatpush.msra.mxu0 %v421_v14  ;;  %77 = vmatpush.msra.mxu1 %v421_v14 }
  0x1f   :  { %103 = vmatpush.msra.mxu2 %v421_v14  ;;  %129 = vmatpush.msra.mxu3 %v421_v14 }
  0x20   :  { %53 = vmatpush.msra.mxu0 %v430_v15  ;;  %78 = vmatpush.msra.mxu1 %v430_v15 }
  0x21   :  { %54 = vmatmul.f32.vlgmr.msra.gmra.mxu0 %v18_v16  ;;  %104 = vmatpush.msra.mxu2 %v430_v15 }
  0x22   :  { %130 = vmatpush.msra.mxu3 %v430_v15  ;;  %141 = vmatpush.msrb.mxu0 %v301_v0 }
  0x23   :  { %167 = vmatpush.msrb.mxu1 %v301_v0  ;;  %193 = vmatpush.msrb.mxu2 %v301_v0 }
  0x24   :  { %142 = vmatpush.msrb.mxu0 %v306_v1  ;;  %219 = vmatpush.msrb.mxu3 %v301_v0 }
  0x25   :  { %168 = vmatpush.msrb.mxu1 %v306_v1  ;;  %194 = vmatpush.msrb.mxu2 %v306_v1 }
  0x26   :  { %143 = vmatpush.msrb.mxu0 %v313_v2  ;;  %220 = vmatpush.msrb.mxu3 %v306_v1 }
  0x27   :  { %169 = vmatpush.msrb.mxu1 %v313_v2  ;;  %195 = vmatpush.msrb.mxu2 %v313_v2 }
  0x28   :  { %144 = vmatpush.msrb.mxu0 %v322_v3  ;;  %221 = vmatpush.msrb.mxu3 %v313_v2 }
  0x29   :  { %170 = vmatpush.msrb.mxu1 %v322_v3  ;;  %196 = vmatpush.msrb.mxu2 %v322_v3 }
  0x2a   :  { %145 = vmatpush.msrb.mxu0 %v331_v4  ;;  %222 = vmatpush.msrb.mxu3 %v322_v3 }
  0x2b   :  { %171 = vmatpush.msrb.mxu1 %v331_v4  ;;  %197 = vmatpush.msrb.mxu2 %v331_v4 }
  0x2c   :  { %146 = vmatpush.msrb.mxu0 %v340_v5  ;;  %223 = vmatpush.msrb.mxu3 %v331_v4 }
  0x2d   :  { %172 = vmatpush.msrb.mxu1 %v340_v5  ;;  %198 = vmatpush.msrb.mxu2 %v340_v5 }
  0x2e   :  { %147 = vmatpush.msrb.mxu0 %v349_v6  ;;  %224 = vmatpush.msrb.mxu3 %v340_v5 }
  0x2f   :  { %173 = vmatpush.msrb.mxu1 %v349_v6  ;;  %199 = vmatpush.msrb.mxu2 %v349_v6 }
  0x30   :  { %148 = vmatpush.msrb.mxu0 %v358_v7  ;;  %225 = vmatpush.msrb.mxu3 %v349_v6 }
  0x31   :  { %174 = vmatpush.msrb.mxu1 %v358_v7  ;;  %200 = vmatpush.msrb.mxu2 %v358_v7 }
  0x32   :  { %149 = vmatpush.msrb.mxu0 %v367_v8  ;;  %226 = vmatpush.msrb.mxu3 %v358_v7 }
  0x33   :  { %175 = vmatpush.msrb.mxu1 %v367_v8  ;;  %201 = vmatpush.msrb.mxu2 %v367_v8 }
  0x34   :  { %150 = vmatpush.msrb.mxu0 %v376_v9  ;;  %227 = vmatpush.msrb.mxu3 %v367_v8 }
  0x35   :  { %176 = vmatpush.msrb.mxu1 %v376_v9  ;;  %202 = vmatpush.msrb.mxu2 %v376_v9 }
  0x36   :  { %151 = vmatpush.msrb.mxu0 %v385_v10  ;;  %228 = vmatpush.msrb.mxu3 %v376_v9 }
  0x37   :  { %177 = vmatpush.msrb.mxu1 %v385_v10  ;;  %203 = vmatpush.msrb.mxu2 %v385_v10 }
  0x38   :  { %152 = vmatpush.msrb.mxu0 %v394_v11  ;;  %229 = vmatpush.msrb.mxu3 %v385_v10 }
  0x39   :  { %178 = vmatpush.msrb.mxu1 %v394_v11  ;;  %204 = vmatpush.msrb.mxu2 %v394_v11 }
  0x3a   :  { %153 = vmatpush.msrb.mxu0 %v403_v12  ;;  %230 = vmatpush.msrb.mxu3 %v394_v11 }
  0x3b   :  { %179 = vmatpush.msrb.mxu1 %v403_v12  ;;  %205 = vmatpush.msrb.mxu2 %v403_v12 }
  0x3c   :  { %154 = vmatpush.msrb.mxu0 %v412_v13  ;;  %231 = vmatpush.msrb.mxu3 %v403_v12 }
  0x3d   :  { %180 = vmatpush.msrb.mxu1 %v412_v13  ;;  %206 = vmatpush.msrb.mxu2 %v412_v13 }
  0x3e   :  { %155 = vmatpush.msrb.mxu0 %v421_v14  ;;  %232 = vmatpush.msrb.mxu3 %v412_v13 }
  0x3f   :  { %181 = vmatpush.msrb.mxu1 %v421_v14  ;;  %207 = vmatpush.msrb.mxu2 %v421_v14 }
  0x40   :  { %156 = vmatpush.msrb.mxu0 %v430_v15  ;;  %233 = vmatpush.msrb.mxu3 %v421_v14 }
  0x41   :  { %182 = vmatpush.msrb.mxu1 %v430_v15  ;;  %208 = vmatpush.msrb.mxu2 %v430_v15 }
  0x42   :  { %234 = vmatpush.msrb.mxu3 %v430_v15 }
  0x9e   :  { %v55_v18 = vpop.f32.mrf.mxu0 }
  0x9f   :  { %v58_v19 = vadd.f32 %v55_v18, %v37_v17 }
  0xa1   :  { %262 = vtanh.f32 %v58_v19 }
  0xa7   :  { %v263_v20 = vpop.eup %262 }
  0xa8   :  { %60 = vst [vmem:[%s560_s3] sm:$0xff] %v263_v20  ;;  %79 = vmatmul.f32.vlgmr.msra.gmra.mxu1 %v263_v20 }
 0x125   :  { %v80_v22 = vpop.f32.mrf.mxu1 }
 0x126   :  { %v83_v23 = vadd.f32 %v248_v21, %v80_v22 }
 0x128   :  { %264 = vtanh.f32 %v83_v23 }
 0x12e   :  { %v265_v24 = vpop.eup %264 }
 0x12f   :  { %249 = vst [vmem:[%s560_s3 + $0x8] sm:$0xff] %v265_v24  ;;  %105 = vmatmul.f32.vlgmr.msra.gmra.mxu2 %v265_v24 }
 0x1b2   :  { %v106_v26 = vpop.f32.mrf.mxu2 }
 0x1b3   :  { %v109_v27 = vadd.f32 %v250_v25, %v106_v26 }
 0x1b5   :  { %266 = vtanh.f32 %v109_v27 }
 0x1bb   :  { %v267_v28 = vpop.eup %266 }
 0x1bc   :  { %251 = vst [vmem:[%s560_s3 + $0x10] sm:$0xff] %v267_v28  ;;  %131 = vmatmul.f32.vlgmr.msra.gmra.mxu3 %v267_v28 }
 0x23f   :  { %v132_v30 = vpop.f32.mrf.mxu3 }
 0x240   :  { %v135_v31 = vadd.f32 %v252_v29, %v132_v30 }
 0x242   :  { %268 = vtanh.f32 %v135_v31 }
 0x248   :  { %v269_v32 = vpop.eup %268 }
 0x249   :  { %253 = vst [vmem:[%s560_s3 + $0x18] sm:$0xff] %v269_v32  ;;  %157 = vmatmul.f32.vlgmr.msrb.gmra.mxu0 %v269_v32 }
 0x2c6   :  { %v158_v34 = vpop.f32.mrf.mxu0 }
 0x2c7   :  { %v161_v35 = vadd.f32 %v254_v33, %v158_v34 }
 0x2c9   :  { %270 = vtanh.f32 %v161_v35 }
 0x2cf   :  { %v271_v36 = vpop.eup %270 }
 0x2d0   :  { %255 = vst [vmem:[%s560_s3 + $0x20] sm:$0xff] %v271_v36  ;;  %183 = vmatmul.f32.vlgmr.msrb.gmra.mxu1 %v271_v36 }
 0x34d   :  { %v184_v38 = vpop.f32.mrf.mxu1 }
 0x34e   :  { %v187_v39 = vadd.f32 %v256_v37, %v184_v38 }
 0x350   :  { %272 = vtanh.f32 %v187_v39 }
 0x356   :  { %v273_v40 = vpop.eup %272 }
 0x357   :  { %257 = vst [vmem:[%s560_s3 + $0x28] sm:$0xff] %v273_v40  ;;  %209 = vmatmul.f32.vlgmr.msrb.gmra.mxu2 %v273_v40 }
 0x3da   :  { %v210_v42 = vpop.f32.mrf.mxu2 }
 0x3db   :  { %v213_v43 = vadd.f32 %v258_v41, %v210_v42 }
 0x3dd   :  { %274 = vtanh.f32 %v213_v43 }
 0x3e3   :  { %v275_v44 = vpop.eup %274 }
 0x3e4   :  { %259 = vst [vmem:[%s560_s3 + $0x30] sm:$0xff] %v275_v44  ;;  %235 = vmatmul.f32.vlgmr.msrb.gmra.mxu3 %v275_v44 }
 0x467   :  { %v236_v46 = vpop.f32.mrf.mxu3 }
 0x468   :  { %v239_v47 = vadd.f32 %v260_v45, %v236_v46 }
 0x46a   :  { %276 = vtanh.f32 %v239_v47 }
 0x470   :  { %v277_v48 = vpop.eup %276 }
 0x471   :  { %261 = vst [vmem:[%s560_s3 + $0x38] sm:$0xff] %v277_v48 }

</bundles_post_ra>
